<compile_context>
chip_gen: v7x
topology: tpu7x:2x2x1
jax: 0.10.0
libtpu: 0.0.40
codegen_flags: <defaults>
</compile_context>

<pallas_src>
import functools

import jax
import jax.numpy as jnp
import numpy as np
from jax.experimental import pallas as pl
from jax.experimental.pallas import tpu as pltpu  # noqa: F401


def _round_up(n, m):
    return (n + m - 1) // m * m


# ------------------------------- Pallas kernel -------------------------------

def conv_unit_kernel(pt_ref, w_ref, shift_ref, o_ref, *, n_pool, n_pad,
                     activ_type, pool_type):
    """Fused conv(one matmul) + folded-BN shift + activation + pool reduction."""
    # Single MXU matmul covering all pool positions (lane-concatenated):
    #   (C_pad, K_pad) @ (K_pad, n_pool * n_pad)  -> f32 accumulate
    y = jnp.dot(w_ref[...], pt_ref[...], preferred_element_type=jnp.float32)
    y = y + shift_ref[...]                       # folded conv bias + BatchNorm shift
    if activ_type == "relu":
        y = jnp.maximum(y, 0.0)
    elif activ_type == "gelu":
        y = jax.nn.gelu(y, approximate=False)
    else:
        raise ValueError(activ_type)

    # Pool over the n_pool lane-aligned slices (slice starts are multiples of 128).
    acc = y[:, 0:n_pad]
    for p in range(1, n_pool):
        blk = y[:, p * n_pad:(p + 1) * n_pad]
        if pool_type == "max":
            acc = jnp.maximum(acc, blk)
        elif pool_type == "avg":
            acc = acc + blk
        else:
            raise ValueError(pool_type)
    if pool_type == "avg":
        acc = acc * (1.0 / n_pool)

    o_ref[...] = acc.astype(o_ref.dtype)


# ------------------------------- JAX glue ------------------------------------

def _im2col_pooled_lanes(x, k_pad, n_pad, ksize=3, pad=1, pool=2):
    """x: (B, Cin, H, W) -> Pt: (k_pad, pool*pool * n_pad) bf16.

    Pt[k, p*n_pad + n] = x_padded[b, ci, pool*i + pi + di, pool*j + pj + dj]
    with p = pi*pool + pj, k = ci*9 + di*3 + dj, n = b*Ho*Wo + i*Wo + j.
    Zero-padded up to k_pad rows and n_pad lanes per pool position.
    """
    B, Cin, H, W = x.shape
    Ho, Wo = H // pool, W // pool
    N = B * Ho * Wo
    K = Cin * ksize * ksize
    P = pool * pool

    xp = jnp.pad(x, ((0, 0), (0, 0), (pad, pad), (pad, pad)))
    cols = []
    for di in range(ksize):
        for dj in range(ksize):
            cols.append(xp[:, :, di:di + H, dj:dj + W])
    patches = jnp.stack(cols, axis=2)                        # (B, Cin, 9, H, W)
    patches = patches.reshape(B, Cin, ksize * ksize, Ho, pool, Wo, pool)
    patches = patches.transpose(4, 6, 1, 2, 0, 3, 5)         # (pi, pj, Cin, 9, B, Ho, Wo)
    pt = patches.reshape(P, K, N)                            # (P, K, N)
    pt = jnp.pad(pt, ((0, 0), (0, k_pad - K), (0, n_pad - N)))
    pt = pt.transpose(1, 0, 2).reshape(k_pad, P * n_pad)     # pool positions lane-concat
    return pt.astype(jnp.bfloat16)


def conv_unit_forward(x, w, b, gamma, beta, mean, var, *,
                      activ_type="relu", pool_type="max", eps=1e-5):
    """One ConvUnit: Conv2d(k=3,s=1,p=1) -> BatchNorm2d -> activ -> 2x2 pool (stride 2)."""
    B, Cin, H, W = x.shape
    Cout = w.shape[0]
    Ho, Wo = H // 2, W // 2
    N = B * Ho * Wo
    K = Cin * 9
    P = 4

    n_pad = _round_up(N, 128)        # lane-dense output & pool segments
    k_pad = _round_up(K, 8)
    c_pad = _round_up(Cout, 8)       # sublane-dense output rows

    pt = _im2col_pooled_lanes(x, k_pad, n_pad)               # (k_pad, 4*n_pad) bf16

    inv_std = gamma / jnp.sqrt(var + eps)
    w_scaled = w.reshape(Cout, K) * inv_std[:, None]         # fold BN scale into weights
    w_mat = jnp.zeros((c_pad, k_pad), jnp.float32).at[:Cout, :K].set(w_scaled)
    w_mat = w_mat.astype(jnp.bfloat16)
    shift = beta + (b - mean) * inv_std                      # folded conv bias + BN shift
    shift_p = jnp.zeros((c_pad, 1), jnp.float32).at[:Cout, 0].set(shift)

    kernel = functools.partial(conv_unit_kernel, n_pool=P, n_pad=n_pad,
                               activ_type=activ_type, pool_type=pool_type)

    out = pl.pallas_call(
        kernel,
        out_shape=jax.ShapeDtypeStruct((c_pad, n_pad), jnp.float32),
        grid=(1,),
        in_specs=[
            pl.BlockSpec((k_pad, P * n_pad), lambda i: (0, 0)),
            pl.BlockSpec((c_pad, k_pad), lambda i: (0, 0)),
            pl.BlockSpec((c_pad, 1), lambda i: (0, 0)),
        ],
        out_specs=pl.BlockSpec((c_pad, n_pad), lambda i: (0, 0)),
    )(pt, w_mat, shift_p)

    # (c_pad, n_pad) -> (B, Cout, Ho, Wo)  (NCHW), dropping padding
    out = out[:Cout, :N]
    return out.reshape(Cout, B, Ho, Wo).transpose(1, 0, 2, 3)


@functools.partial(jax.jit, static_argnames=("activ_type", "pool_type"))
def mnist_conv_encoder_forward(x, params, activ_type="relu", pool_type="max"):
    """MNISTConvEncoder forward: two ConvUnits, then flatten to (B, 196)."""
    out1 = conv_unit_forward(x, *params["unit1"], activ_type=activ_type, pool_type=pool_type)
    out2 = conv_unit_forward(out1, *params["unit2"], activ_type=activ_type, pool_type=pool_type)
    B = out2.shape[0]
    return out2.reshape(B, -1)                               # (B, 196), PyTorch .view order


# ---------------------------- pure-JAX reference ------------------------------

def _ref_conv_unit(x, w, b, gamma, beta, mean, var, *, activ_type="relu",
                   pool_type="max", eps=1e-5, match_kernel_bf16=False):
    inv_std = gamma / jnp.sqrt(var + eps)
    if match_kernel_bf16:
        # Mirror the kernel's bf16 rounding of the matmul operands (f32 accumulation).
        x_q = x.astype(jnp.bfloat16).astype(jnp.float32)
        w_q = (w * inv_std[:, None, None, None]).astype(jnp.bfloat16).astype(jnp.float32)
        y = jax.lax.conv_general_dilated(
            x_q, w_q, window_strides=(1, 1), padding=((1, 1), (1, 1)),
            dimension_numbers=("NCHW", "OIHW", "NCHW"),
            precision=jax.lax.Precision.HIGHEST)
        y = y + (beta + (b - mean) * inv_std)[None, :, None, None]
    else:
        y = jax.lax.conv_general_dilated(
            x, w, window_strides=(1, 1), padding=((1, 1), (1, 1)),
            dimension_numbers=("NCHW", "OIHW", "NCHW"),
            precision=jax.lax.Precision.HIGHEST)
        y = y + b[None, :, None, None]
        y = (y - mean[None, :, None, None]) * inv_std[None, :, None, None] \
            + beta[None, :, None, None]
    if activ_type == "relu":
        y = jnp.maximum(y, 0.0)
    else:
        y = jax.nn.gelu(y, approximate=False)
    if pool_type == "max":
        y = jax.lax.reduce_window(y, -jnp.inf, jax.lax.max,
                                  (1, 1, 2, 2), (1, 1, 2, 2), "VALID")
    else:
        y = jax.lax.reduce_window(y, 0.0, jax.lax.add,
                                  (1, 1, 2, 2), (1, 1, 2, 2), "VALID") * 0.25
    return y


def _ref_forward(x, params, activ_type="relu", pool_type="max", match_kernel_bf16=False):
    o1 = _ref_conv_unit(x, *params["unit1"], activ_type=activ_type,
                        pool_type=pool_type, match_kernel_bf16=match_kernel_bf16)
    o2 = _ref_conv_unit(o1, *params["unit2"], activ_type=activ_type,
                        pool_type=pool_type, match_kernel_bf16=match_kernel_bf16)
    return o2.reshape(o2.shape[0], -1)


# ----------------------------------- main -------------------------------------

def _make_unit_params(key, cin, cout):
    ks = jax.random.split(key, 6)
    w = 0.3 * jax.random.normal(ks[0], (cout, cin, 3, 3), jnp.float32)
    b = 0.1 * jax.random.normal(ks[1], (cout,), jnp.float32)
    gamma = 1.0 + 0.1 * jax.random.normal(ks[2], (cout,), jnp.float32)
    beta = 0.1 * jax.random.normal(ks[3], (cout,), jnp.float32)
    mean = 0.1 * jax.random.normal(ks[4], (cout,), jnp.float32)
    var = jnp.abs(jax.random.normal(ks[5], (cout,), jnp.float32)) + 0.5
    return (w, b, gamma, beta, mean, var)


if __name__ == "__main__":
    key = jax.random.PRNGKey(0)
    kx, k1, k2 = jax.random.split(key, 3)

    B = 2
    # MNIST-shaped input (NCHW): 28x28 single-channel images -> flattened output (B, 196)
    x = jax.random.normal(kx, (B, 1, 28, 28), jnp.float32)

    params = {
        "unit1": _make_unit_params(k1, 1, 4),
        "unit2": _make_unit_params(k2, 4, 4),
    }

    # Validate both pool paths (relu activation, as in the default module config).
    for pool_type in ("max", "avg"):
        out = mnist_conv_encoder_forward(x, params, activ_type="relu", pool_type=pool_type)
        out = jax.block_until_ready(out)
        assert out.shape == (B, 196), out.shape
        out_np = np.asarray(out, dtype=np.float32)

        # 1) Kernel/layout correctness: reference with matching bf16 operand rounding.
        ref_q = np.asarray(_ref_forward(x, params, activ_type="relu", pool_type=pool_type,
                                        match_kernel_bf16=True), dtype=np.float32)
        np.testing.assert_allclose(out_np, ref_q, atol=2e-2, rtol=2e-2)

        # 2) Fidelity to the full-f32 module (bounds the bf16 quantization of operands).
        ref = np.asarray(_ref_forward(x, params, activ_type="relu", pool_type=pool_type,
                                      match_kernel_bf16=False), dtype=np.float32)
        rel_rms = np.linalg.norm(out_np - ref) / max(np.linalg.norm(ref), 1e-6)
        assert rel_rms < 2e-2, rel_rms

    print("KERNEL_OK")
</pallas_src>

<mosaic_0001>
module attributes {stable_mosaic.version = 11 : i64} {
  func.func @conv_unit_kernel(%arg0: i32, %arg1: memref<16x2048xbf16, #tpu.memory_space<vmem>>, %arg2: memref<8x16xbf16, #tpu.memory_space<vmem>>, %arg3: memref<8x1xf32, #tpu.memory_space<vmem>>, %arg4: memref<8x512xf32, #tpu.memory_space<vmem>>) attributes {dimension_semantics = [#tpu.dimension_semantics<arbitrary>], iteration_bounds = array<i64: 1>, scalar_prefetch = 0 : i64, scratch_operands = 0 : i64, tpu.core_type = #tpu.core_type<tc>, window_params = [{pipeline_mode = #tpu.pipeline_mode<synchronous>, transform_indices = @transform_0, window_bounds = array<i64: 16, 2048>}, {pipeline_mode = #tpu.pipeline_mode<synchronous>, transform_indices = @transform_1, window_bounds = array<i64: 8, 16>}, {pipeline_mode = #tpu.pipeline_mode<synchronous>, transform_indices = @transform_2, window_bounds = array<i64: 8, 1>}, {pipeline_mode = #tpu.pipeline_mode<synchronous>, transform_indices = @transform_3, window_bounds = array<i64: 8, 512>}]} {
    %c0 = arith.constant 0 : index
    %c0_0 = arith.constant 0 : index
    %0 = vector.load %arg2[%c0, %c0_0] : memref<8x16xbf16, #tpu.memory_space<vmem>>, vector<8x16xbf16>
    %c0_1 = arith.constant 0 : index
    %c0_2 = arith.constant 0 : index
    %1 = vector.load %arg1[%c0_1, %c0_2] : memref<16x2048xbf16, #tpu.memory_space<vmem>>, vector<16x2048xbf16>
    %cst = arith.constant dense<0.000000e+00> : vector<8x2048xf32>
    %2 = tpu.matmul %0, %1, %cst {dimension_numbers = #tpu.dot_dimension_numbers<[1], [0], [0], [1], [0, 0, 1, 1], [], []>} : vector<8x16xbf16>, vector<16x2048xbf16>, vector<8x2048xf32> -> vector<8x2048xf32>
    %c0_3 = arith.constant 0 : index
    %c0_4 = arith.constant 0 : index
    %3 = vector.load %arg3[%c0_3, %c0_4] : memref<8x1xf32, #tpu.memory_space<vmem>>, vector<8x1xf32>
    %4 = vector.broadcast %3 : vector<8x1xf32> to vector<8x2048xf32>
    %5 = arith.addf %2, %4 : vector<8x2048xf32>
    %cst_5 = arith.constant 0.000000e+00 : f32
    %6 = vector.broadcast %cst_5 : f32 to vector<8x2048xf32>
    %7 = arith.maximumf %5, %6 : vector<8x2048xf32>
    %8 = vector.extract_strided_slice %7 {offsets = [0, 0], sizes = [8, 512], strides = [1, 1]} : vector<8x2048xf32> to vector<8x512xf32>
    %9 = vector.extract_strided_slice %7 {offsets = [0, 512], sizes = [8, 512], strides = [1, 1]} : vector<8x2048xf32> to vector<8x512xf32>
    %10 = arith.maximumf %8, %9 : vector<8x512xf32>
    %11 = vector.extract_strided_slice %7 {offsets = [0, 1024], sizes = [8, 512], strides = [1, 1]} : vector<8x2048xf32> to vector<8x512xf32>
    %12 = arith.maximumf %10, %11 : vector<8x512xf32>
    %13 = vector.extract_strided_slice %7 {offsets = [0, 1536], sizes = [8, 512], strides = [1, 1]} : vector<8x2048xf32> to vector<8x512xf32>
    %14 = arith.maximumf %12, %13 : vector<8x512xf32>
    %c0_6 = arith.constant 0 : index
    %c0_7 = arith.constant 0 : index
    %15 = vector.load %arg4[%c0_6, %c0_7] : memref<8x512xf32, #tpu.memory_space<vmem>>, vector<8x512xf32>
    tpu.vector_store %arg4[%c0_6, %c0_7], %14 {strides = array<i32>} : memref<8x512xf32, #tpu.memory_space<vmem>>, vector<8x512xf32>,
    return
  }
  func.func @transform_0(%arg0: i32) -> (i32, i32) {
    %c0_i32 = arith.constant 0 : i32
    %c0_i32_0 = arith.constant 0 : i32
    %c0_i32_1 = arith.constant 0 : i32
    return %c0_i32, %c0_i32_0 : i32, i32
  }
  func.func @transform_1(%arg0: i32) -> (i32, i32) {
    %c0_i32 = arith.constant 0 : i32
    %c0_i32_0 = arith.constant 0 : i32
    %c0_i32_1 = arith.constant 0 : i32
    return %c0_i32, %c0_i32_0 : i32, i32
  }
  func.func @transform_2(%arg0: i32) -> (i32, i32) {
    %c0_i32 = arith.constant 0 : i32
    %c0_i32_0 = arith.constant 0 : i32
    %c0_i32_1 = arith.constant 0 : i32
    return %c0_i32, %c0_i32_0 : i32, i32
  }
  func.func @transform_3(%arg0: i32) -> (i32, i32) {
    %c0_i32 = arith.constant 0 : i32
    %c0_i32_0 = arith.constant 0 : i32
    %c0_i32_1 = arith.constant 0 : i32
    return %c0_i32, %c0_i32_0 : i32, i32
  }
}

module attributes {stable_mosaic.version = 11 : i64} {
  func.func @conv_unit_kernel(%arg0: i32, %arg1: memref<40x512xbf16, #tpu.memory_space<vmem>>, %arg2: memref<8x40xbf16, #tpu.memory_space<vmem>>, %arg3: memref<8x1xf32, #tpu.memory_space<vmem>>, %arg4: memref<8x128xf32, #tpu.memory_space<vmem>>) attributes {dimension_semantics = [#tpu.dimension_semantics<arbitrary>], iteration_bounds = array<i64: 1>, scalar_prefetch = 0 : i64, scratch_operands = 0 : i64, tpu.core_type = #tpu.core_type<tc>, window_params = [{pipeline_mode = #tpu.pipeline_mode<synchronous>, transform_indices = @transform_0, window_bounds = array<i64: 40, 512>}, {pipeline_mode = #tpu.pipeline_mode<synchronous>, transform_indices = @transform_1, window_bounds = array<i64: 8, 40>}, {pipeline_mode = #tpu.pipeline_mode<synchronous>, transform_indices = @transform_2, window_bounds = array<i64: 8, 1>}, {pipeline_mode = #tpu.pipeline_mode<synchronous>, transform_indices = @transform_3, window_bounds = array<i64: 8, 128>}]} {
    %c0 = arith.constant 0 : index
    %c0_0 = arith.constant 0 : index
    %0 = vector.load %arg2[%c0, %c0_0] : memref<8x40xbf16, #tpu.memory_space<vmem>>, vector<8x40xbf16>
    %c0_1 = arith.constant 0 : index
    %c0_2 = arith.constant 0 : index
    %1 = vector.load %arg1[%c0_1, %c0_2] : memref<40x512xbf16, #tpu.memory_space<vmem>>, vector<40x512xbf16>
    %cst = arith.constant dense<0.000000e+00> : vector<8x512xf32>
    %2 = tpu.matmul %0, %1, %cst {dimension_numbers = #tpu.dot_dimension_numbers<[1], [0], [0], [1], [0, 0, 1, 1], [], []>} : vector<8x40xbf16>, vector<40x512xbf16>, vector<8x512xf32> -> vector<8x512xf32>
    %c0_3 = arith.constant 0 : index
    %c0_4 = arith.constant 0 : index
    %3 = vector.load %arg3[%c0_3, %c0_4] : memref<8x1xf32, #tpu.memory_space<vmem>>, vector<8x1xf32>
    %4 = vector.broadcast %3 : vector<8x1xf32> to vector<8x512xf32>
    %5 = arith.addf %2, %4 : vector<8x512xf32>
    %cst_5 = arith.constant 0.000000e+00 : f32
    %6 = vector.broadcast %cst_5 : f32 to vector<8x512xf32>
    %7 = arith.maximumf %5, %6 : vector<8x512xf32>
    %8 = vector.extract_strided_slice %7 {offsets = [0, 0], sizes = [8, 128], strides = [1, 1]} : vector<8x512xf32> to vector<8x128xf32>
    %9 = vector.extract_strided_slice %7 {offsets = [0, 128], sizes = [8, 128], strides = [1, 1]} : vector<8x512xf32> to vector<8x128xf32>
    %10 = arith.maximumf %8, %9 : vector<8x128xf32>
    %11 = vector.extract_strided_slice %7 {offsets = [0, 256], sizes = [8, 128], strides = [1, 1]} : vector<8x512xf32> to vector<8x128xf32>
    %12 = arith.maximumf %10, %11 : vector<8x128xf32>
    %13 = vector.extract_strided_slice %7 {offsets = [0, 384], sizes = [8, 128], strides = [1, 1]} : vector<8x512xf32> to vector<8x128xf32>
    %14 = arith.maximumf %12, %13 : vector<8x128xf32>
    %c0_6 = arith.constant 0 : index
    %c0_7 = arith.constant 0 : index
    %15 = vector.load %arg4[%c0_6, %c0_7] : memref<8x128xf32, #tpu.memory_space<vmem>>, vector<8x128xf32>
    tpu.vector_store %arg4[%c0_6, %c0_7], %14 {strides = array<i32>} : memref<8x128xf32, #tpu.memory_space<vmem>>, vector<8x128xf32>,
    return
  }
  func.func @transform_0(%arg0: i32) -> (i32, i32) {
    %c0_i32 = arith.constant 0 : i32
    %c0_i32_0 = arith.constant 0 : i32
    %c0_i32_1 = arith.constant 0 : i32
    return %c0_i32, %c0_i32_0 : i32, i32
  }
  func.func @transform_1(%arg0: i32) -> (i32, i32) {
    %c0_i32 = arith.constant 0 : i32
    %c0_i32_0 = arith.constant 0 : i32
    %c0_i32_1 = arith.constant 0 : i32
    return %c0_i32, %c0_i32_0 : i32, i32
  }
  func.func @transform_2(%arg0: i32) -> (i32, i32) {
    %c0_i32 = arith.constant 0 : i32
    %c0_i32_0 = arith.constant 0 : i32
    %c0_i32_1 = arith.constant 0 : i32
    return %c0_i32, %c0_i32_0 : i32, i32
  }
  func.func @transform_3(%arg0: i32) -> (i32, i32) {
    %c0_i32 = arith.constant 0 : i32
    %c0_i32_0 = arith.constant 0 : i32
    %c0_i32_1 = arith.constant 0 : i32
    return %c0_i32, %c0_i32_0 : i32, i32
  }
}

</mosaic_0001>

<bundles_post_ra>
// kernel: mnist_conv_encoder_forward.2
= control target key start
LH: loop header
LB: loop body
LE: loop exit
PB: predicated region body
PF: predicated region fallthrough
CT: control target
= control target key end

     0   :  { %v512_v3 = vmov 0   ;;  %vm118_vm0 = vcmask 130048   ;;  %s616_s0 = inlined_call_operand.vmem [shape: bf16[16,2048], index: 0, kind: input, shape index: {}]   ;;  %s617_s1 = inlined_call_operand.vmem [shape: bf16[8,16], index: 1, kind: input, shape index: {}]   ;;  %s618_s2 = inlined_call_operand.vmem [shape: f32[8,1], index: 2, kind: input, shape index: {}]   ;;  %s619_s3 = inlined_call_operand.vmem [shape: f32[8,512], index: 3, kind: output, shape index: {}]  }
   0x1   :  { %v16_v0 = vld [vmem:[%s616_s0] sm:$0xff]  ;;  %v17_v2 = vld [vmem:[%s616_s0 + $0x8] sm:$0xff]  ;;  %154 = vmatprep.mubr.bf16.mxu0 %v512_v3  ;;  %195 = vmatprep.mubr.bf16.mxu1 %v512_v3  ;;  %v18_v7 = vld [vmem:[%s616_s0 + $0x10] sm:$0xff] }
   0x2   :  { %v24_v1 = vld [vmem:[%s616_s0 + $0x40] sm:$0xff]  ;;  %v25_v5 = vld [vmem:[%s616_s0 + $0x48] sm:$0xff]  ;;  %511 = vset.pattern.permute.xlu0 %v512_v3  ;;  %v26_v10 = vld [vmem:[%s616_s0 + $0x50] sm:$0xff] }
   0x3   :  { %v487_v4 = vcombine.high %v16_v0, %v24_v1  ;;  %v486_v6 = vcombine.low %v16_v0, %v24_v1  ;;  %v489_v8 = vcombine.high %v17_v2, %v25_v5  ;;  %v488_v9 = vcombine.low %v17_v2, %v25_v5  ;;  %v19_v11 = vld [vmem:[%s616_s0 + $0x18] sm:$0xff]  ;;  %v20_v15 = vld [vmem:[%s616_s0 + $0x20] sm:$0xff]  ;;  %v21_v19 = vld [vmem:[%s616_s0 + $0x28] sm:$0xff] }
   0x4   :  { %v27_v12 = vld [vmem:[%s616_s0 + $0x58] sm:$0xff]  ;;  %v491_v13 = vcombine.high %v18_v7, %v26_v10  ;;  %v28_v16 = vld [vmem:[%s616_s0 + $0x60] sm:$0xff]  ;;  %v490_v18 = vcombine.low %v18_v7, %v26_v10  ;;  %v29_v20 = vld [vmem:[%s616_s0 + $0x68] sm:$0xff] }
   0x5   :  { %122 = vmatprep.subr.bf16.mxu0 %v487_v4  ;;  %v493_v14 = vcombine.high %v19_v11, %v27_v12  ;;  %163 = vmatprep.subr.bf16.mxu1 %v489_v8  ;;  %v15_v17 = vld [vmem:[%s617_s1] sm:$0xf]  ;;  %v492_v21 = vcombine.low %v19_v11, %v27_v12  ;;  %v495_v23 = vcombine.high %v20_v15, %v28_v16  ;;  %v22_v25 = vld [vmem:[%s616_s0 + $0x30] sm:$0xff]  ;;  %v23_v28 = vld [vmem:[%s616_s0 + $0x38] sm:$0xff] }
   0x6   :  { %123 = vmatpush1.bf16.msra.mxu0 %v486_v6  ;;  %164 = vmatpush1.bf16.msra.mxu1 %v488_v9  ;;  %v32_v22 = vld [vmem:[%s618_s2] sm:$0xff]  ;;  %v497_v24 = vcombine.high %v21_v19, %v29_v20  ;;  %v30_v26 = vld [vmem:[%s616_s0 + $0x70] sm:$0xff]  ;;  %v494_v27 = vcombine.low %v20_v15, %v28_v16  ;;  %v31_v29 = vld [vmem:[%s616_s0 + $0x78] sm:$0xff]  ;;  %v496_v30 = vcombine.low %v21_v19, %v29_v20 }
   0x7   :  { %204 = vmatprep.subr.bf16.mxu0 %v491_v13  ;;  %245 = vmatprep.subr.bf16.mxu1 %v493_v14  ;;  %v499_v31 = vcombine.high %v22_v25, %v30_v26  ;;  %v501_v32 = vcombine.high %v23_v28, %v31_v29  ;;  %v498_v33 = vcombine.low %v22_v25, %v30_v26 }
   0x8   :  { %35 = vperm.xlu0 %511, %v32_v22   ;;  %v500_v34 = vcombine.low %v23_v28, %v31_v29 }
   0x9   :  { %502 = vmatmul.mubr.msk.bf16.vlgmr.msra.gmra.mrb[0].mxu0 %vm118_vm0, %v15_v17  ;;  %503 = vmatmul.mubr.msk.bf16.vlgmr.msra.gmra.mrb[0].mxu1 %vm118_vm0, %v15_v17 }
   0xa   :  { %205 = vmatpush1.bf16.msra.mxu0 %v490_v18  ;;  %246 = vmatpush1.bf16.msra.mxu1 %v492_v21 }
   0xb   :  { %236 = vmatprep.mubr.bf16.mxu0 %v512_v3  ;;  %277 = vmatprep.mubr.bf16.mxu1 %v512_v3 }
   0xc   :  { %286 = vmatprep.subr.bf16.mxu0 %v495_v23  ;;  %327 = vmatprep.subr.bf16.mxu1 %v497_v24 }
  0x11   :  { %504 = vmatmul.mubr.msk.bf16.vlgmr.msra.gmra.mrb[4].mxu0 %vm118_vm0, %v15_v17  ;;  %505 = vmatmul.mubr.msk.bf16.vlgmr.msra.gmra.mrb[4].mxu1 %vm118_vm0, %v15_v17 }
  0x12   :  { %287 = vmatpush1.bf16.msra.mxu0 %v494_v27  ;;  %328 = vmatpush1.bf16.msra.mxu1 %v496_v30 }
  0x13   :  { %318 = vmatprep.mubr.bf16.mxu0 %v512_v3  ;;  %359 = vmatprep.mubr.bf16.mxu1 %v512_v3 }
  0x14   :  { %368 = vmatprep.subr.bf16.mxu0 %v499_v31  ;;  %409 = vmatprep.subr.bf16.mxu1 %v501_v32 }
  0x19   :  { %506 = vmatmul.mubr.msk.bf16.vlgmr.msra.gmra.mrb[8].mxu0 %vm118_vm0, %v15_v17  ;;  %507 = vmatmul.mubr.msk.bf16.vlgmr.msra.gmra.mrb[8].mxu1 %vm118_vm0, %v15_v17 }
  0x1a   :  { %369 = vmatpush1.bf16.msra.mxu0 %v498_v33  ;;  %410 = vmatpush1.bf16.msra.mxu1 %v500_v34 }
  0x1b   :  { %400 = vmatprep.mubr.bf16.mxu0 %v512_v3  ;;  %441 = vmatprep.mubr.bf16.mxu1 %v512_v3 }
  0x21   :  { %508 = vmatmul.mubr.msk.bf16.vlgmr.msra.gmra.mrb[12].mxu0 %vm118_vm0, %v15_v17  ;;  %509 = vmatmul.mubr.msk.bf16.vlgmr.msra.gmra.mrb[12].mxu1 %vm118_vm0, %v15_v17 }
  0x87   :  { %v36_v42 = vpop.permute.xlu0 %35 }
  0xdc   :  { %v156_v35 = vpop.f32.mrb[0].mxu0  ;;  %v197_v36 = vpop.f32.mrb[0].mxu1 }
  0xdd   :  { %v158_v37 = vpop.f32.mrb[1].mxu0  ;;  %v199_v38 = vpop.f32.mrb[1].mxu1  ;;  %v157_v44 = vadd.f32 %v156_v35, %v36_v42  ;;  %v198_v47 = vadd.f32 %v197_v36, %v36_v42 }
  0xde   :  { %v160_v39 = vpop.f32.mrb[2].mxu0  ;;  %v201_v40 = vpop.f32.mrb[2].mxu1  ;;  %v159_v45 = vadd.f32 %v158_v37, %v36_v42  ;;  %v200_v48 = vadd.f32 %v199_v38, %v36_v42 }
  0xdf   :  { %v161_v41 = vpop.f32.mrb[3].mxu0  ;;  %v202_v43 = vpop.f32.mrb[3].mxu1  ;;  %v450_v56 = vmax.f32 %v157_v44, 0.0  ;;  %v452_v62 = vmax.f32 %v198_v47, 0.0 }
  0xe0   :  { %v451_v61 = vmax.f32 %v159_v45, 0.0  ;;  %v453_v2 = vmax.f32 %v200_v48, 0.0 }
  0xe4   :  { %v238_v46 = vpop.f32.mrb[4].mxu0  ;;  %v279_v50 = vpop.f32.mrb[4].mxu1 }
  0xe5   :  { %v239_v49 = vadd.f32 %v238_v46, %v36_v42  ;;  %v240_v51 = vpop.f32.mrb[5].mxu0  ;;  %v280_v52 = vadd.f32 %v279_v50, %v36_v42  ;;  %v281_v54 = vpop.f32.mrb[5].mxu1 }
  0xe6   :  { %v241_v53 = vadd.f32 %v240_v51, %v36_v42  ;;  %v242_v55 = vpop.f32.mrb[6].mxu0  ;;  %v282_v58 = vadd.f32 %v281_v54, %v36_v42  ;;  %v283_v59 = vpop.f32.mrb[6].mxu1 }
  0xe7   :  { %v454_v57 = vmax.f32 %v239_v49, 0.0  ;;  %v243_v60 = vpop.f32.mrb[7].mxu0  ;;  %v456_v63 = vmax.f32 %v280_v52, 0.0  ;;  %v284_v1 = vpop.f32.mrb[7].mxu1 }
  0xe8   :  { %v455_v0 = vmax.f32 %v241_v53, 0.0  ;;  %v457_v4 = vmax.f32 %v282_v58, 0.0 }
  0xe9   :  { %v466_v3 = vmax.f32 %v450_v56, %v454_v57  ;;  %v468_v5 = vmax.f32 %v452_v62, %v456_v63 }
  0xea   :  { %v467_v6 = vmax.f32 %v451_v61, %v455_v0  ;;  %v469_v7 = vmax.f32 %v453_v2, %v457_v4 }
  0xec   :  { %v320_v8 = vpop.f32.mrb[8].mxu0  ;;  %v361_v10 = vpop.f32.mrb[8].mxu1 }
  0xed   :  { %v321_v9 = vadd.f32 %v320_v8, %v36_v42  ;;  %v322_v11 = vpop.f32.mrb[9].mxu0  ;;  %v362_v12 = vadd.f32 %v361_v10, %v36_v42  ;;  %v363_v14 = vpop.f32.mrb[9].mxu1 }
  0xee   :  { %v323_v13 = vadd.f32 %v322_v11, %v36_v42  ;;  %v324_v15 = vpop.f32.mrb[10].mxu0  ;;  %v364_v17 = vadd.f32 %v363_v14, %v36_v42  ;;  %v365_v18 = vpop.f32.mrb[10].mxu1 }
  0xef   :  { %v458_v16 = vmax.f32 %v321_v9, 0.0  ;;  %v325_v19 = vpop.f32.mrb[11].mxu0  ;;  %v460_v20 = vmax.f32 %v362_v12, 0.0  ;;  %v366_v22 = vpop.f32.mrb[11].mxu1 }
  0xf0   :  { %v459_v21 = vmax.f32 %v323_v13, 0.0  ;;  %v461_v24 = vmax.f32 %v364_v17, 0.0 }
  0xf1   :  { %v470_v23 = vmax.f32 %v466_v3, %v458_v16  ;;  %v472_v25 = vmax.f32 %v468_v5, %v460_v20 }
  0xf2   :  { %v471_v26 = vmax.f32 %v467_v6, %v459_v21  ;;  %v473_v27 = vmax.f32 %v469_v7, %v461_v24 }
  0xf4   :  { %v402_v28 = vpop.f32.mrb[12].mxu0  ;;  %v443_v30 = vpop.f32.mrb[12].mxu1 }
  0xf5   :  { %v403_v29 = vadd.f32 %v402_v28, %v36_v42  ;;  %v404_v31 = vpop.f32.mrb[13].mxu0  ;;  %v444_v32 = vadd.f32 %v443_v30, %v36_v42  ;;  %v445_v34 = vpop.f32.mrb[13].mxu1 }
  0xf6   :  { %v405_v33 = vadd.f32 %v404_v31, %v36_v42  ;;  %v406_v35 = vpop.f32.mrb[14].mxu0  ;;  %v446_v37 = vadd.f32 %v445_v34, %v36_v42  ;;  %v447_v38 = vpop.f32.mrb[14].mxu1 }
  0xf7   :  { %v462_v36 = vmax.f32 %v403_v29, 0.0  ;;  %v407_v39 = vpop.f32.mrb[15].mxu0  ;;  %v464_v40 = vmax.f32 %v444_v32, 0.0  ;;  %v448_v43 = vpop.f32.mrb[15].mxu1 }
  0xf8   :  { %v463_v41 = vmax.f32 %v405_v33, 0.0  ;;  %v465_v45 = vmax.f32 %v446_v37, 0.0 }
  0xf9   :  { %v474_v44 = vmax.f32 %v470_v23, %v462_v36  ;;  %v476_v46 = vmax.f32 %v472_v25, %v464_v40 }
  0xfa   :  { %v475_v47 = vmax.f32 %v471_v26, %v463_v41  ;;  %v477_v48 = vmax.f32 %v473_v27, %v465_v45 }
  0xfb   :  { %478 = vst [vmem:[%s619_s3] sm:$0xff] %v474_v44  ;;  %480 = vst [vmem:[%s619_s3 + $0x10] sm:$0xff] %v476_v46 }
  0xfc   :  { %479 = vst [vmem:[%s619_s3 + $0x8] sm:$0xff] %v475_v47  ;;  %481 = vst [vmem:[%s619_s3 + $0x18] sm:$0xff] %v477_v48 }

// kernel: mnist_conv_encoder_forward.3
= control target key start
LH: loop header
LB: loop body
LE: loop exit
PB: predicated region body
PF: predicated region fallthrough
CT: control target
= control target key end

     0   :  { %v227_v1 = vmov 0   ;;  %vm86_vm0 = vcmask 1043456   ;;  %vm82_vm1 = vcmask 326656   ;;  %s287_s0 = inlined_call_operand.vmem [shape: bf16[40,512], index: 0, kind: input, shape index: {}]   ;;  %s288_s2 = inlined_call_operand.vmem [shape: f32[8,1], index: 2, kind: input, shape index: {}]   ;;  %s289_s1 = inlined_call_operand.vmem [shape: bf16[8,40], index: 1, kind: input, shape index: {}]   ;;  %s290_s3 = inlined_call_operand.vmem [shape: f32[8,128], index: 3, kind: output, shape index: {}]  }
   0x1   :  { %v211_v0 = vld [vmem:[%s287_s0 + $0x4] ss:$16 sps:$4 sm:$0xff]   ;;  %131 = vmatprep.mubr.bf16.mxu0 %v227_v1  ;;  %172 = vmatprep.mubr.bf16.mxu1 %v227_v1  ;;  %v213_v2 = vld [vmem:[%s287_s0 + $0xc] ss:$16 sps:$4 sm:$0xff]   ;;  %v215_v3 = vld [vmem:[%s287_s0] ss:$16 sps:$4 sm:$0xff]  }
   0x2   :  { %210 = vset.pattern.permute.xlu0 %v227_v1  ;;  %99 = vmatprep.subr.bf16.mxu0 %v211_v0  ;;  %v216_v4 = vld [vmem:[%s287_s0 + $0x8] ss:$16 sps:$4 sm:$0xff]   ;;  %v217_v5 = vld [vmem:[%s287_s0 + $0x24] ss:$16 sps:$4 sm:$0xff]   ;;  %v219_v6 = vld [vmem:[%s287_s0 + $0x2c] ss:$16 sps:$4 sm:$0xff]  }
   0x3   :  { %140 = vmatprep.subr.bf16.mxu1 %v213_v2  ;;  %100 = vmatpush1.bf16.msra.mxu0 %v215_v3  ;;  %v221_v7 = vld [vmem:[%s287_s0 + $0x20] ss:$16 sps:$4 sm:$0xff]   ;;  %v222_v8 = vld [vmem:[%s287_s0 + $0x28] ss:$16 sps:$4 sm:$0xff]  }
   0x4   :  { %141 = vmatpush1.bf16.msra.mxu1 %v216_v4  ;;  %101 = vmatprep.subr.bf16.mxu0 %v217_v5  ;;  %v24_v9 = vld [vmem:[%s287_s0 + $0x40] sm:$0xff]  ;;  %v25_v10 = vld [vmem:[%s287_s0 + $0x48] sm:$0xff] }
   0x5   :  { %142 = vmatprep.subr.bf16.mxu1 %v219_v6  ;;  %v202_v11 = vcombine.high %v24_v9, %v24_v9  ;;  %v204_v12 = vcombine.high %v25_v10, %v25_v10  ;;  %v201_v13 = vcombine.low %v24_v9, %v24_v9  ;;  %v203_v14 = vcombine.low %v25_v10, %v25_v10  ;;  %v26_v15 = vld [vmem:[%s288_s2] sm:$0xff] }
   0x6   :  { %29 = vperm.xlu0 %210, %v26_v15   ;;  %v15_v18 = vld [vmem:[%s289_s1] sm:$0xf] }
   0x7   :  { %102 = vmatpush1.bf16.msra.mxu0 %v221_v7  ;;  %v88_v16 = vsel %vm86_vm0, %v201_v13, 0  ;;  %v94_v17 = vsel %vm86_vm0, %v203_v14, 0 }
   0x8   :  { %143 = vmatpush1.bf16.msra.mxu1 %v222_v8  ;;  %205 = vmatprep.subr.msk.bf16.mxu0 %vm86_vm0, %v202_v11 }
   0x9   :  { %207 = vmatprep.subr.msk.bf16.mxu1 %vm86_vm0, %v204_v12 }
   0xb   :  { %104 = vmatpush1.bf16.msra.mxu0 %v88_v16 }
   0xc   :  { %145 = vmatpush1.bf16.msra.mxu1 %v94_v17 }
   0xe   :  { %206 = vmatmul.mubr.msk.bf16.vlgmr.msra.gmra.mrb[0].mxu0 %vm82_vm1, %v15_v18 }
   0xf   :  { %208 = vmatmul.mubr.msk.bf16.vlgmr.msra.gmra.mrb[0].mxu1 %vm82_vm1, %v15_v18 }
  0x85   :  { %v30_v19 = vpop.permute.xlu0 %29 }
  0xe1   :  { %v133_v20 = vpop.f32.mrb[0].mxu0 }
  0xe2   :  { %v174_v21 = vpop.f32.mrb[0].mxu1  ;;  %v134_v22 = vadd.f32 %v133_v20, %v30_v19  ;;  %v135_v23 = vpop.f32.mrb[1].mxu0 }
  0xe3   :  { %v176_v24 = vpop.f32.mrb[1].mxu1  ;;  %v175_v25 = vadd.f32 %v174_v21, %v30_v19  ;;  %v136_v26 = vadd.f32 %v135_v23, %v30_v19  ;;  %v137_v27 = vpop.f32.mrb[2].mxu0 }
  0xe4   :  { %v178_v28 = vpop.f32.mrb[2].mxu1  ;;  %v181_v29 = vmax.f32 %v134_v22, 0.0  ;;  %v138_v30 = vpop.f32.mrb[3].mxu0  ;;  %v177_v33 = vadd.f32 %v176_v24, %v30_v19 }
  0xe5   :  { %v179_v31 = vpop.f32.mrb[3].mxu1  ;;  %v182_v32 = vmax.f32 %v136_v26, 0.0  ;;  %v183_v34 = vmax.f32 %v175_v25, 0.0 }
  0xe6   :  { %v184_v36 = vmax.f32 %v177_v33, 0.0 }
  0xe7   :  { %v185_v35 = vmax.f32 %v181_v29, %v182_v32 }
  0xe9   :  { %v186_v37 = vmax.f32 %v185_v35, %v183_v34 }
  0xeb   :  { %v187_v38 = vmax.f32 %v186_v37, %v184_v36 }
  0xed   :  { %188 = vst [vmem:[%s290_s3] sm:$0xff] %v187_v38 }

</bundles_post_ra>
